<compile_context>
chip_gen: v6e
topology: v6e:2x2x1
jax: 0.10.0
libtpu: 0.0.40
codegen_flags: <defaults>
</compile_context>

<pallas_src>
import functools

import jax
import jax.numpy as jnp
from jax.experimental import pallas as pl
from jax.experimental.pallas import tpu as pltpu


_DMA_TARGET_BYTES = 8 << 20   # target ~8 MiB of X per grid step
_SLACK_BYTES = 4 << 20        # headroom for Mosaic-internal scratch / small buffers


def _round_up(x, n):
    return ((x + n - 1) // n) * n


def _vmem_budget_bytes():
    """Chip-aware VMEM budget: physical capacity minus headroom."""
    phys = 64 << 20  # conservative default (v7x per-TensorCore VMEM)
    try:
        info = pltpu.get_tpu_info()
        for name in ("vmem_capacity_bytes", "vmem_size_bytes", "vmem_bytes"):
            val = getattr(info, name, None)
            if val:
                phys = int(val)
                break
    except Exception:
        pass
    # ~52 MiB on 64-MiB v7x, ~108 MiB on 128-MiB v5e/v6e.
    return max(32 << 20, min(phys - (12 << 20), int(phys * 0.85)))


def _pick_tk(rows_per_step, resident_bytes, k_pad, itemsize, budget):
    """Largest useful K tile (multiple of 128) that fits the budget; 0 if none."""
    avail = budget - resident_bytes - _SLACK_BYTES
    if avail <= 0:
        return 0
    fit = (avail // (2 * rows_per_step * itemsize)) // 128 * 128  # double-buffered X
    if fit < 128:
        return 0
    target = _round_up(max(_DMA_TARGET_BYTES // (rows_per_step * itemsize), 1), 128)
    return int(min(k_pad, fit, target))


def _plan_fused(m, k, itemsize, budget, force_m_blocks=None):
    """Pick (m_blocks, tm, tk) for the fused style-loss kernel."""
    k_pad = _round_up(k, 128)

    def tk_for(tm, rows_per_step):
        resident = 2 * tm * m * 4  # f32 accumulator + single-buffered style-gram rows
        return _pick_tk(rows_per_step, resident, k_pad, itemsize, budget)

    if force_m_blocks is not None and force_m_blocks > 1:
        if m % force_m_blocks or (m // force_m_blocks) % 8:
            raise ValueError("force_m_blocks must split a*b into 8-aligned row blocks")
        tm = m // force_m_blocks
        tk = tk_for(tm, tm + m)
        if not tk:
            raise ValueError("requested row blocking does not fit the VMEM budget")
        return force_m_blocks, tm, tk

    # Single row block: X is read from HBM exactly once (minimal traffic).
    tk1 = tk_for(m, m)
    # Split rows when the single-block residency does not fit, or when m is large
    # enough that the kernel is MXU-bound and a 'parallel' M axis can use both
    # TensorCores on megacore parts (v7x).
    want_split = m >= 1024
    if tk1 and not want_split:
        return 1, m, tk1
    for tm in sorted((t for t in range(8, m, 8) if m % t == 0), reverse=True):
        tk = tk_for(tm, tm + m)
        if tk:
            return m // tm, tm, tk
    if tk1:
        return 1, m, tk1
    # TODO(synk): add full 2-D (tm, tn) gram tiling for extremely large a*b.
    raise ValueError("style-loss gram does not fit in VMEM even with row blocking "
                     "(a*b = %d)" % m)


def _mask_ragged_k(x, kk, tk, k_valid):
    """Zero lanes past the true K extent (ragged last K tile / overhanging block)."""
    col = kk * tk + jax.lax.broadcasted_iota(jnp.int32, x.shape, x.ndim - 1)
    return jnp.where(col < k_valid, x, jnp.zeros_like(x))


# ---------------------------------------------------------------------------
# Kernel 1: gram matrix  G = (X @ X^T) / total_elems   (K-tiled reduction)
# ---------------------------------------------------------------------------
def _gram_kernel(x_ref, g_ref, *, inv_total, k_valid, tk, ragged):
    kk = pl.program_id(0)

    @pl.when(kk == 0)
    def _():
        g_ref[...] = jnp.zeros_like(g_ref)

    x = x_ref[...]
    if ragged:
        x = _mask_ragged_k(x, kk, tk, k_valid)
    # NT matmul (contract K of both operands): no XLU transpose, f32 MXU accumulate.
    # Per-step inv_total scaling keeps the f32 accumulator well-conditioned.
    g_ref[...] += jax.lax.dot_general(
        x, x, dimension_numbers=(((1,), (1,)), ((), ())),
        preferred_element_type=jnp.float32) * inv_total


def gram_matrix_pallas(x_nchw, *, _force_tk=None):
    a, b, c, d = x_nchw.shape
    m, k = a * b, c * d
    x2d = jnp.reshape(x_nchw, (m, k))  # matches torch.reshape (row-major)
    if x2d.dtype not in (jnp.float32, jnp.bfloat16):
        x2d = x2d.astype(jnp.float32)
    itemsize = x2d.dtype.itemsize
    budget = _vmem_budget_bytes()
    # The (m, m) f32 output is the resident accumulator (assume 2 pipeline buffers).
    tk = _pick_tk(m, 2 * m * m * 4, _round_up(k, 128), itemsize, budget)
    if not tk:
        # TODO(synk): add (tm, tn) output tiling for extremely large a*b.
        raise ValueError("gram accumulator does not fit in VMEM (a*b = %d)" % m)
    if _force_tk is not None:
        tk = _force_tk
    nsteps = -(-k // tk)
    ragged = (k % tk) != 0
    inv_total = 1.0 / float(a * b * c * d)

    return pl.pallas_call(
        functools.partial(_gram_kernel, inv_total=inv_total, k_valid=k, tk=tk,
                          ragged=ragged),
        out_shape=jax.ShapeDtypeStruct((m, m), jnp.float32),
        grid_spec=pltpu.PrefetchScalarGridSpec(
            num_scalar_prefetch=0,
            grid=(nsteps,),
            in_specs=[pl.BlockSpec((m, tk), lambda kk: (0, kk))],
            out_specs=pl.BlockSpec((m, m), lambda kk: (0, 0)),  # resident accumulator
        ),
        compiler_params=pltpu.CompilerParams(
            dimension_semantics=("arbitrary",),
            vmem_limit_bytes=budget),
        cost_estimate=pl.CostEstimate(
            flops=2 * m * m * k,
            bytes_accessed=m * k * itemsize + m * m * 4,
            transcendentals=0),
    )(x2d)


# ---------------------------------------------------------------------------
# Kernel 2: fused forward hot path — gram(input) kept on-chip + MSE vs. style gram
# ---------------------------------------------------------------------------
def _fused_epilogue(loss_ref, acc_ref, sg_vmem):
    diff = acc_ref[...] - sg_vmem[...]
    ssq = jnp.sum(diff * diff)
    loss_ref[...] = jnp.broadcast_to(ssq, loss_ref.shape)  # lane-dense (8,128) tile


def _style_loss_kernel_1blk(x_ref, sg_hbm, loss_ref, acc_ref, sg_vmem, sg_sem,
                            *, inv_total, k_valid, tk, ragged):
    kk = pl.program_id(0)

    @pl.when(kk == 0)
    def _():
        acc_ref[...] = jnp.zeros_like(acc_ref)
        # Single-buffered style gram: one DMA overlapped with the whole reduction.
        pltpu.make_async_copy(sg_hbm, sg_vmem, sg_sem).start()

    x = x_ref[...]
    if ragged:
        x = _mask_ragged_k(x, kk, tk, k_valid)
    acc_ref[...] += jax.lax.dot_general(
        x, x, dimension_numbers=(((1,), (1,)), ((), ())),
        preferred_element_type=jnp.float32) * inv_total

    @pl.when(kk == pl.num_programs(0) - 1)
    def _():
        pltpu.make_async_copy(sg_hbm, sg_vmem, sg_sem).wait()
        _fused_epilogue(loss_ref, acc_ref, sg_vmem)


def _style_loss_kernel_mblk(xr_ref, xc_ref, sg_hbm, loss_ref, acc_ref, sg_vmem, sg_sem,
                            *, inv_total, k_valid, tk, tm, ragged):
    i = pl.program_id(0)
    kk = pl.program_id(1)

    @pl.when(kk == 0)
    def _():
        acc_ref[...] = jnp.zeros_like(acc_ref)
        r0 = pl.multiple_of(i * tm, 8)
        pltpu.make_async_copy(sg_hbm.at[pl.ds(r0, tm), :], sg_vmem, sg_sem).start()

    xr = xr_ref[...]
    xc = xc_ref[...]
    if ragged:
        xr = _mask_ragged_k(xr, kk, tk, k_valid)
        xc = _mask_ragged_k(xc, kk, tk, k_valid)
    acc_ref[...] += jax.lax.dot_general(
        xr, xc, dimension_numbers=(((1,), (1,)), ((), ())),
        preferred_element_type=jnp.float32) * inv_total

    @pl.when(kk == pl.num_programs(1) - 1)
    def _():
        r0 = pl.multiple_of(i * tm, 8)
        pltpu.make_async_copy(sg_hbm.at[pl.ds(r0, tm), :], sg_vmem, sg_sem).wait()
        _fused_epilogue(loss_ref, acc_ref, sg_vmem)


def style_loss_pallas(x_nchw, style_gram, *, downcast_to_bf16=False,
                      force_m_blocks=None, force_tk=None):
    """mean((gram(x) - style_gram)**2); the input gram never leaves the chip."""
    a, b, c, d = x_nchw.shape
    m, k = a * b, c * d
    x2d = jnp.reshape(x_nchw, (m, k))
    if downcast_to_bf16 and x2d.dtype == jnp.float32:
        # Optional numerics tradeoff (HBM-bound case on v5e/v6e): halve input bytes,
        # keep f32 MXU accumulation.
        x2d = x2d.astype(jnp.bfloat16)
    if x2d.dtype not in (jnp.float32, jnp.bfloat16):
        x2d = x2d.astype(jnp.float32)
    sg = style_gram.astype(jnp.float32)

    itemsize = x2d.dtype.itemsize
    budget = _vmem_budget_bytes()
    m_blocks, tm, tk = _plan_fused(m, k, itemsize, budget,
                                   force_m_blocks=force_m_blocks)
    if force_tk is not None:
        tk = force_tk
    nsteps = -(-k // tk)
    ragged = (k % tk) != 0
    inv_total = 1.0 / float(a * b * c * d)
    inv_mm = 1.0 / float(m * m)

    out_shape = jax.ShapeDtypeStruct((8, m_blocks * 128), jnp.float32)

    if m_blocks == 1:
        parts = pl.pallas_call(
            functools.partial(_style_loss_kernel_1blk, inv_total=inv_total,
                              k_valid=k, tk=tk, ragged=ragged),
            out_shape=out_shape,
            grid_spec=pltpu.PrefetchScalarGridSpec(
                num_scalar_prefetch=0,
                grid=(nsteps,),
                in_specs=[
                    pl.BlockSpec((m, tk), lambda kk: (0, kk)),  # X K-tile (pipelined)
                    pl.BlockSpec(memory_space=pl.ANY),          # style gram stays in HBM
                ],
                out_specs=pl.BlockSpec((8, 128), lambda kk: (0, 0)),
                scratch_shapes=[
                    pltpu.VMEM((m, m), jnp.float32),   # gram accumulator (on-chip only)
                    pltpu.VMEM((m, m), jnp.float32),   # single-buffered style gram
                    pltpu.SemaphoreType.DMA(()),
                ],
            ),
            compiler_params=pltpu.CompilerParams(
                dimension_semantics=("arbitrary",),
                vmem_limit_bytes=budget),
            cost_estimate=pl.CostEstimate(
                flops=2 * m * m * k,
                bytes_accessed=m * k * itemsize + m * m * 4 + 8 * 128 * 4,
                transcendentals=0),
        )(x2d, sg)
    else:
        parts = pl.pallas_call(
            functools.partial(_style_loss_kernel_mblk, inv_total=inv_total,
                              k_valid=k, tk=tk, tm=tm, ragged=ragged),
            out_shape=out_shape,
            grid_spec=pltpu.PrefetchScalarGridSpec(
                num_scalar_prefetch=0,
                grid=(m_blocks, nsteps),
                in_specs=[
                    pl.BlockSpec((tm, tk), lambda i, kk: (i, kk)),  # row-block operand
                    pl.BlockSpec((m, tk), lambda i, kk: (0, kk)),   # column operand
                    pl.BlockSpec(memory_space=pl.ANY),              # style gram (HBM)
                ],
                out_specs=pl.BlockSpec((8, 128), lambda i, kk: (0, i)),
                scratch_shapes=[
                    pltpu.VMEM((tm, m), jnp.float32),  # per-row-block accumulator
                    pltpu.VMEM((tm, m), jnp.float32),  # single-buffered style-gram rows
                    pltpu.SemaphoreType.DMA(()),
                ],
            ),
            compiler_params=pltpu.CompilerParams(
                # Independent row blocks -> megacore (v7x) splits them across
                # TensorCores; K stays the sequential reduction axis.
                dimension_semantics=("parallel", "arbitrary"),
                vmem_limit_bytes=budget),
            cost_estimate=pl.CostEstimate(
                flops=2 * m * m * k,
                bytes_accessed=(m_blocks + 1) * m * k * itemsize + m * m * 4,
                transcendentals=0),
        )(x2d, x2d, sg)

    # Lane 0 of each row-block's (8, 128) tile carries that block's sum of squares.
    return jnp.sum(parts[0, ::128]) * inv_mm


class StyleLossModulePallas:
    """Pallas equivalent of style_loss_module: forward is a pass-through; the MSE
    between the input gram and the fixed style gram is stored on `self.loss`."""

    def __init__(self, style_pic):
        self.style_pic_gram = gram_matrix_pallas(style_pic)   # detached constant
        self.loss = None

    def __call__(self, x_nchw):
        self.loss = style_loss_pallas(x_nchw, self.style_pic_gram)
        return x_nchw  # pass-through, matching the PyTorch forward


if __name__ == "__main__":
    key = jax.random.PRNGKey(0)
    k_style, k_inp, k_style2, k_inp2 = jax.random.split(key, 4)

    def gram_ref(t):
        aa, bb, cc, dd = t.shape
        m2 = jnp.reshape(t, (aa * bb, cc * dd))
        return (m2 @ m2.T) / (aa * bb * cc * dd)

    # --- Test 1: small NCHW shapes, single-row-block fused path ----------------
    a, b, c, d = 2, 4, 16, 16
    style_pic = jax.random.normal(k_style, (a, b, c, d), dtype=jnp.float32)
    x = jax.random.normal(k_inp, (a, b, c, d), dtype=jnp.float32)

    module = StyleLossModulePallas(style_pic)
    out = module(x)
    jax.block_until_ready(out)
    jax.block_until_ready(module.loss)

    ref_gram = gram_ref(style_pic)
    ref_loss = jnp.mean((gram_ref(x) - ref_gram) ** 2)
    assert jnp.allclose(out, x), "forward must be a pass-through"
    assert jnp.allclose(module.style_pic_gram, ref_gram, rtol=1e-5, atol=1e-6), (
        "style gram mismatch")
    assert jnp.allclose(module.loss, ref_loss, rtol=1e-5, atol=1e-6), (
        module.loss, ref_loss)

    # --- Test 2: ragged K (18*18 = 324, not a multiple of 128) + forced row
    #     blocking / multi-step K reduction exercising the megacore path --------
    a2, b2, c2, d2 = 1, 32, 18, 18
    style2 = jax.random.normal(k_style2, (a2, b2, c2, d2), dtype=jnp.float32)
    x2 = jax.random.normal(k_inp2, (a2, b2, c2, d2), dtype=jnp.float32)

    sg2 = gram_matrix_pallas(style2)
    loss2_single = style_loss_pallas(x2, sg2)
    loss2_blocked = style_loss_pallas(x2, sg2, force_m_blocks=2, force_tk=128)
    jax.block_until_ready((sg2, loss2_single, loss2_blocked))

    ref2_gram = gram_ref(style2)
    ref2_loss = jnp.mean((gram_ref(x2) - ref2_gram) ** 2)
    assert jnp.allclose(sg2, ref2_gram, rtol=1e-5, atol=1e-6), "ragged gram mismatch"
    assert jnp.allclose(loss2_single, ref2_loss, rtol=1e-5, atol=1e-6), (
        loss2_single, ref2_loss)
    assert jnp.allclose(loss2_blocked, ref2_loss, rtol=1e-5, atol=1e-6), (
        loss2_blocked, ref2_loss)

    print("KERNEL_OK")
</pallas_src>

<mosaic_0001>
module attributes {stable_mosaic.version = 11 : i64} {
  func.func @_gram_kernel(%arg0: i32, %arg1: memref<8x256xf32, #tpu.memory_space<vmem>>, %arg2: memref<8x8xf32, #tpu.memory_space<vmem>>) attributes {dimension_semantics = [#tpu.dimension_semantics<arbitrary>], iteration_bounds = array<i64: 1>, scalar_prefetch = 0 : i64, scratch_operands = 0 : i64, tpu.core_type = #tpu.core_type<tc>, window_params = [{transform_indices = @transform_0, window_bounds = array<i64: 8, 256>}, {pipeline_mode = #tpu.pipeline_mode<synchronous>, transform_indices = @transform_1, window_bounds = array<i64: 8, 8>}]} {
    %c0_i32 = arith.constant 0 : i32
    %0 = arith.cmpi eq, %arg0, %c0_i32 : i32
    %1 = arith.extui %0 : i1 to i32
    %c0_i32_0 = arith.constant 0 : i32
    %2 = arith.cmpi ne, %1, %c0_i32_0 : i32
    scf.if %2 {
      %cst_7 = arith.constant 0.000000e+00 : f32
      %10 = vector.broadcast %cst_7 : f32 to vector<8x8xf32>
      %c0_8 = arith.constant 0 : index
      %c0_9 = arith.constant 0 : index
      %11 = vector.load %arg2[%c0_8, %c0_9] : memref<8x8xf32, #tpu.memory_space<vmem>>, vector<8x8xf32>
      tpu.vector_store %arg2[%c0_8, %c0_9], %10 {strides = array<i32>} : memref<8x8xf32, #tpu.memory_space<vmem>>, vector<8x8xf32>,
    } else {
    }
    %c0 = arith.constant 0 : index
    %c0_1 = arith.constant 0 : index
    %3 = vector.load %arg1[%c0, %c0_1] : memref<8x256xf32, #tpu.memory_space<vmem>>, vector<8x256xf32>
    %c0_2 = arith.constant 0 : index
    %c0_3 = arith.constant 0 : index
    %4 = vector.load %arg2[%c0_2, %c0_3] : memref<8x8xf32, #tpu.memory_space<vmem>>, vector<8x8xf32>
    %cst = arith.constant dense<0.000000e+00> : vector<8x8xf32>
    %5 = tpu.matmul %3, %3, %cst {dimension_numbers = #tpu.dot_dimension_numbers<[1], [1], [0], [0], [0, 0, 1, 0], [], []>} : vector<8x256xf32>, vector<8x256xf32>, vector<8x8xf32> -> vector<8x8xf32>
    %cst_4 = arith.constant 4.8828125E-4 : f32
    %6 = vector.broadcast %cst_4 : f32 to vector<8x8xf32>
    %7 = arith.mulf %5, %6 : vector<8x8xf32>
    %8 = arith.addf %4, %7 : vector<8x8xf32>
    %c0_5 = arith.constant 0 : index
    %c0_6 = arith.constant 0 : index
    %9 = vector.load %arg2[%c0_5, %c0_6] : memref<8x8xf32, #tpu.memory_space<vmem>>, vector<8x8xf32>
    tpu.vector_store %arg2[%c0_5, %c0_6], %8 {strides = array<i32>} : memref<8x8xf32, #tpu.memory_space<vmem>>, vector<8x8xf32>,
    return
  }
  func.func @transform_0(%arg0: i32) -> (i32, i32) {
    %c0_i32 = arith.constant 0 : i32
    %c0_i32_0 = arith.constant 0 : i32
    return %c0_i32, %arg0 : i32, i32
  }
  func.func @transform_1(%arg0: i32) -> (i32, i32) {
    %c0_i32 = arith.constant 0 : i32
    %c0_i32_0 = arith.constant 0 : i32
    %c0_i32_1 = arith.constant 0 : i32
    return %c0_i32, %c0_i32_0 : i32, i32
  }
}

</mosaic_0001>

<bundles_post_ra>
// kernel: tpu_custom_call.1
= control target key start
LH: loop header
LB: loop body
LE: loop exit
PB: predicated region body
PF: predicated region fallthrough
CT: control target
= control target key end

     0   :  { %6 = vsyncpa [#allocation3], 0  ;;  %s187_s0 = inlined_call_operand.hbm [shape: f32[8,256], index: 0, kind: input, shape index: {}]   ;;  %s188_s1 = inlined_call_operand.hbm [shape: f32[8,8], index: 1, kind: output, shape index: {}]  }
   0x1   :  { %7 = vsyncpa [#allocation4], 0  ;;  %s166_s6 = smov [#allocation2]  }
   0x2   :  { %s14_s7 = sshll.u32 %s166_s6, 4  ;;  %s15_s7 = int_to_ptr.vmem [resolvable:$true] %s14_s7 }
   0x3   :  { %s130_s8 = scalar_lea.vmem %s15_s7, 256  ;;  %p135_p1 = scmp.lt.s32.totalorder %s15_s7, %s15_s7 }
   0x4   :  { %p131_p0 = scmp.ne.s32.totalorder %s15_s7, %s130_s8  ;;  %p136_p2 = scmp.lt.s32.totalorder %s130_s8, %s130_s8 }
   0x6   :  { %p137_p3 = por %p136_p2, %p135_p1 }
   0x8   :  { %p138_p4 = pnand %p137_p3, %p131_p0 }
   0xa   :  { %141 = shalt.err (!%p138_p4)
}
   0xb   :  { %17 = dma.hbm_to_vmem [thread:$0]  %s187_s0, 256, %s15_s7, [#allocation3]  }
   0xc   :  { %162 = dma.done.wait [#allocation3], 256  }
   0xd   :  { %163 = vsyncadd [#allocation3], 4294967040  ;;  %vm25_vm0 = vcmask 64512   ;;  %v167_v0 = vmov 0.0   ;;  %v28_v1 = vld [vmem:[#allocation2 + $0x8] sm:$0xff]  ;;  %v27_v2 = vld [vmem:[#allocation2] sm:$0xff] }
   0xe   :  { %26 = vst.msk [vmem:[#allocation5] sm:$0xff] %vm25_vm0, %v167_v0  ;;  %60 = vmatprep.subr.mxu0 %v28_v1  ;;  %94 = vmatprep.mubr.f32.mxu0 %v28_v1  ;;  %s168_s11 = smov [#allocation5]  }
   0xf   :  { %61 = vmatpush1.xpose.msra.mxu0 %v27_v2  ;;  %s110_s12 = sshll.u32 %s168_s11, 4  ;;  %s111_s12 = int_to_ptr.vmem [resolvable:$true] %s110_s12 }
  0x10   :  { %s142_s0 = scalar_lea.vmem %s111_s12, 128  ;;  %p147_p6 = scmp.lt.s32.totalorder %s111_s12, %s111_s12 }
  0x11   :  { %p143_p5 = scmp.ne.s32.totalorder %s111_s12, %s142_s0  ;;  %p148_p7 = scmp.lt.s32.totalorder %s142_s0, %s142_s0 }
  0x12   :  { %95 = vmatmul.mubr.f32.vlgmr.msra.gmra.mxu0 %v27_v2 }
  0x13   :  { %p149_p8 = por %p148_p7, %p147_p6 }
  0x15   :  { %v29_v3 = vld [vmem:[#allocation5] sm:$0xff]  ;;  %p150_p9 = pnand %p149_p8, %p143_p5 }
  0xd2   :  { %v96_v4 = vpop.f32.mrf.mxu0 }
  0xd3   :  { %v100_v5 = vmul.f32 0.00048828125, %v96_v4 }
  0xd4   :  { %v98_v6 = vpop.f32.mrf.mxu0 }
  0xd5   :  { %v101_v7 = vadd.f32 %v100_v5, %v29_v3 }
  0xd7   :  { %103 = vst.msk [vmem:[#allocation5] sm:$0xff] %vm25_vm0, %v101_v7 }
  0xd8   :  { %153 = shalt.err (!%p150_p9)
}
  0xd9   :  { %113 = dma.vmem_to_hbm [thread:$0]  %s111_s12, 128, %s188_s1, [#allocation4]  }
  0xda   :  { %164 = dma.done.wait [#allocation4], 128  }
  0xdb   :  { %165 = vsyncadd [#allocation4], 4294967168 }
  0xdc   :  { %117 = vsyncpa [#allocation3], 1 }
  0xdd   :  { %118 = vsyncpa [#allocation4], 1 }

</bundles_post_ra>
